<compile_context>
chip_gen: v7x
topology: tpu7x:2x2x1
jax: 0.10.0
libtpu: 0.0.40
codegen_flags: <defaults>
</compile_context>

<pallas_src>
import jax
import jax.numpy as jnp
import numpy as np
from jax import lax
from jax.experimental import pallas as pl
from jax.experimental.pallas import tpu as pltpu


def _round_up(x, m):
    return ((x + m - 1) // m) * m


def _conv_matmul_kernel(x_ref, w_ref, b_ref, o_ref):
    # x_ref: (tm, K) im2col rows; w_ref: (K, tn); b_ref: (1, tn); o_ref: (tm, tn)
    acc = jnp.dot(x_ref[...], w_ref[...], preferred_element_type=jnp.float32)
    o_ref[...] = (acc + b_ref[...]).astype(o_ref.dtype)


def convolution1d_forward(signal, weight, bias, *, stride, tile_m=512, tile_n=128):
    """signal: (B, T, Cin) f32; weight: (Cout, Cin, L); bias: (Cout,)."""
    B, T, Cin = signal.shape
    Cout, Cin_w, L = weight.shape
    assert Cin == Cin_w
    pad = L                                   # nn.Conv1d(..., padding=length)
    T_pad = T + 2 * pad
    T_out = (T_pad - L) // stride + 1

    # ---- plain-JAX glue: zero-pad time, im2col, alignment padding ----
    x_pad = jnp.pad(signal, ((0, 0), (pad, pad), (0, 0)))
    # Per-tap strided slices gathered once here (not in the kernel hot loop).
    taps = [
        x_pad[:, k : k + (T_out - 1) * stride + 1 : stride, :]   # (B, T_out, Cin)
        for k in range(L)
    ]
    x_col = jnp.concatenate(taps, axis=-1).reshape(B * T_out, L * Cin)
    # Weight (Cout, Cin, L) -> (L, Cin, Cout) -> (L*Cin, Cout); row k*Cin+c
    # matches the tap/channel ordering of x_col.
    w_col = jnp.transpose(weight, (2, 1, 0)).reshape(L * Cin, Cout)

    M = B * T_out
    K = L * Cin
    # Alignment: K padded to a lane multiple (zeros are inert in the dot),
    # Cout padded to a lane multiple, M tile a multiple of 8 sublanes.
    K_padded = _round_up(K, 128)
    tn = tile_n
    N_padded = _round_up(Cout, tn)
    tm = min(tile_m, _round_up(M, 8))
    M_padded = _round_up(M, tm)

    x_col = jnp.pad(x_col, ((0, M_padded - M), (0, K_padded - K)))
    w_col = jnp.pad(w_col, ((0, K_padded - K), (0, N_padded - Cout)))
    b_row = jnp.pad(bias.reshape(1, Cout), ((0, 0), (0, N_padded - Cout)))

    grid = (M_padded // tm, N_padded // tn)
    cost = pl.CostEstimate(
        flops=2 * M_padded * K_padded * N_padded,
        transcendentals=0,
        bytes_accessed=4 * (M_padded * K_padded + K_padded * N_padded + N_padded
                            + M_padded * N_padded),
    )

    out_padded = pl.pallas_call(
        _conv_matmul_kernel,
        out_shape=jax.ShapeDtypeStruct((M_padded, N_padded), signal.dtype),
        grid=grid,
        in_specs=[
            pl.BlockSpec((tm, K_padded), lambda i, j: (i, 0)),  # full K, no K-grid
            pl.BlockSpec((K_padded, tn), lambda i, j: (0, j)),
            pl.BlockSpec((1, tn), lambda i, j: (0, j)),
        ],
        out_specs=pl.BlockSpec((tm, tn), lambda i, j: (i, j)),
        compiler_params=pltpu.CompilerParams(
            dimension_semantics=("parallel", "parallel"),
            vmem_limit_bytes=48 * 1024 * 1024,   # headroom even on v7x (64 MiB)
        ),
        cost_estimate=cost,
    )(x_col, w_col, b_row)

    return out_padded[:M, :Cout].reshape(B, T_out, Cout)


def _reference_forward(signal, weight, bias, *, stride):
    # Pure-JAX reference mirroring nn.Conv1d on the permuted input.
    x_ncw = jnp.transpose(signal, (0, 2, 1))               # (B, Cin, T)
    L = weight.shape[-1]
    out = lax.conv_general_dilated(
        x_ncw, weight,
        window_strides=(stride,),
        padding=[(L, L)],
        dimension_numbers=("NCH", "OIH", "NCH"),
    )
    out = out + bias[None, :, None]
    return jnp.transpose(out, (0, 2, 1))                    # (B, T_out, Cout)


if __name__ == "__main__":
    # Module hyperparameters (deterministic, in-script).
    size_in, length, size, stride = 4, 3, 8, 1
    B, T = 2, 16

    key = jax.random.PRNGKey(0)
    k_x, k_w, k_b = jax.random.split(key, 3)

    signal = jax.random.normal(k_x, (B, T, size_in), dtype=jnp.float32)

    # glorot_uniform init for weight (size, size_in, length), uniform bias.
    fan_in = size_in * length
    fan_out = size * length
    limit = float(np.sqrt(6.0 / (fan_in + fan_out)))
    weight = jax.random.uniform(
        k_w, (size, size_in, length), minval=-limit, maxval=limit, dtype=jnp.float32
    )
    b_bound = float(1.0 / np.sqrt(fan_in))
    bias = jax.random.uniform(
        k_b, (size,), minval=-b_bound, maxval=b_bound, dtype=jnp.float32
    )

    out = convolution1d_forward(signal, weight, bias, stride=stride)
    out = jax.block_until_ready(out)

    ref = _reference_forward(signal, weight, bias, stride=stride)
    ref = jax.block_until_ready(ref)

    assert out.shape == ref.shape, (out.shape, ref.shape)
    np.testing.assert_allclose(np.asarray(out), np.asarray(ref), rtol=1e-4, atol=1e-4)

    print("KERNEL_OK")
</pallas_src>

<mosaic_0001>
module attributes {stable_mosaic.version = 11 : i64} {
  func.func @_conv_matmul_kernel(%arg0: i32, %arg1: i32, %arg2: memref<40x128xf32, #tpu.memory_space<vmem>>, %arg3: memref<128x128xf32, #tpu.memory_space<vmem>>, %arg4: memref<1x128xf32, #tpu.memory_space<vmem>>, %arg5: memref<40x128xf32, #tpu.memory_space<vmem>>) attributes {dimension_semantics = [#tpu.dimension_semantics<parallel>, #tpu.dimension_semantics<parallel>], iteration_bounds = array<i64: 1, 1>, scalar_prefetch = 0 : i64, scratch_operands = 0 : i64, tpu.core_type = #tpu.core_type<tc>, window_params = [{transform_indices = @transform_0, window_bounds = array<i64: 40, 128>}, {transform_indices = @transform_1, window_bounds = array<i64: 128, 128>}, {transform_indices = @transform_2, window_bounds = array<i64: 1, 128>}, {transform_indices = @transform_3, window_bounds = array<i64: 40, 128>}]} {
    %c0 = arith.constant 0 : index
    %c0_0 = arith.constant 0 : index
    %0 = vector.load %arg2[%c0, %c0_0] : memref<40x128xf32, #tpu.memory_space<vmem>>, vector<40x128xf32>
    %c0_1 = arith.constant 0 : index
    %c0_2 = arith.constant 0 : index
    %1 = vector.load %arg3[%c0_1, %c0_2] : memref<128x128xf32, #tpu.memory_space<vmem>>, vector<128x128xf32>
    %cst = arith.constant dense<0.000000e+00> : vector<40x128xf32>
    %2 = tpu.matmul %0, %1, %cst {dimension_numbers = #tpu.dot_dimension_numbers<[1], [0], [0], [1], [0, 0, 1, 1], [], []>} : vector<40x128xf32>, vector<128x128xf32>, vector<40x128xf32> -> vector<40x128xf32>
    %c0_3 = arith.constant 0 : index
    %c0_4 = arith.constant 0 : index
    %3 = vector.load %arg4[%c0_3, %c0_4] : memref<1x128xf32, #tpu.memory_space<vmem>>, vector<1x128xf32>
    %4 = vector.broadcast %3 : vector<1x128xf32> to vector<40x128xf32>
    %5 = arith.addf %2, %4 : vector<40x128xf32>
    %c0_5 = arith.constant 0 : index
    %c0_6 = arith.constant 0 : index
    %6 = vector.load %arg5[%c0_5, %c0_6] : memref<40x128xf32, #tpu.memory_space<vmem>>, vector<40x128xf32>
    tpu.vector_store %arg5[%c0_5, %c0_6], %5 {strides = array<i32>} : memref<40x128xf32, #tpu.memory_space<vmem>>, vector<40x128xf32>,
    return
  }
  func.func @transform_0(%arg0: i32, %arg1: i32) -> (i32, i32) {
    %c0_i32 = arith.constant 0 : i32
    %c0_i32_0 = arith.constant 0 : i32
    return %arg0, %c0_i32 : i32, i32
  }
  func.func @transform_1(%arg0: i32, %arg1: i32) -> (i32, i32) {
    %c0_i32 = arith.constant 0 : i32
    %c0_i32_0 = arith.constant 0 : i32
    return %c0_i32, %arg1 : i32, i32
  }
  func.func @transform_2(%arg0: i32, %arg1: i32) -> (i32, i32) {
    %c0_i32 = arith.constant 0 : i32
    %c0_i32_0 = arith.constant 0 : i32
    return %c0_i32, %arg1 : i32, i32
  }
  func.func @transform_3(%arg0: i32, %arg1: i32) -> (i32, i32) {
    %c0_i32 = arith.constant 0 : i32
    return %arg0, %arg1 : i32, i32
  }
}

</mosaic_0001>

<bundles_post_ra>
// kernel: tpu_custom_call.1
= control target key start
LH: loop header
LB: loop body
LE: loop exit
PB: predicated region body
PF: predicated region fallthrough
CT: control target
= control target key end

     0   :  { %8 = vsyncpa [#allocation3], 0  ;;  %s459_s0 = inlined_call_operand.hbm [shape: f32[40,128], index: 0, kind: input, shape index: {}]   ;;  %s460_s1 = inlined_call_operand.hbm [shape: f32[128,128], index: 1, kind: input, shape index: {}]   ;;  %s461_s2 = inlined_call_operand.vmem [shape: f32[1,128], index: 2, kind: input, shape index: {}]   ;;  %s462_s3 = inlined_call_operand.hbm [shape: f32[40,128], index: 3, kind: output, shape index: {}]  }
   0x1   :  { %9 = vsyncpa [#allocation6], 0 }
   0x2   :  { %10 = vsyncpa [#allocation4], 0  ;;  %s373_s12 = smov [#allocation2]   ;;  %s301_s16 = scalar_lea.hbm %s459_s0, 640 }
   0x3   :  { %s16_s13 = sshll.u32 %s373_s12, 4  ;;  %p302_p0 = scmp.ne.s32.totalorder %s459_s0, %s301_s16  ;;  %s17_s13 = int_to_ptr.vmem [resolvable:$true] %s16_s13 }
   0x4   :  { %p305_p1 = scmp.lt.u32.totalorder %s301_s16, %s459_s0 }
   0x6   :  { %p307_p2 = pnand %p305_p1, %p302_p0 }
   0x8   :  { %310 = shalt.err (!%p307_p2)
}
   0x9   :  { %s311_s21 = scalar_lea.vmem %s17_s13, 640  ;;  %p316_p4 = scmp.lt.s32.totalorder %s17_s13, %s17_s13 }
   0xa   :  { %p312_p3 = scmp.ne.s32.totalorder %s17_s13, %s311_s21  ;;  %p317_p5 = scmp.lt.s32.totalorder %s311_s21, %s311_s21 }
   0xc   :  { %p318_p6 = por %p317_p5, %p316_p4 }
   0xe   :  { %p319_p7 = pnand %p318_p6, %p312_p3 }
  0x10   :  { %322 = shalt.err (!%p319_p7)
}
  0x11   :  { %s374_s22 = smov 128   ;;  %s375_s23 = smov 8  }
  0x12   :  { %22 = dma.hbm_to_vmem [thread:$0]  %s459_s0, 640, %s17_s13, [#allocation3], %s374_s22, %s374_s22, %s375_s23  }
  0x13   :  { %s376_s26 = smov [#allocation5]   ;;  %s323_s30 = scalar_lea.hbm %s460_s1, 2048 }
  0x14   :  { %s28_s27 = sshll.u32 %s376_s26, 4  ;;  %p324_p8 = scmp.ne.s32.totalorder %s460_s1, %s323_s30  ;;  %s29_s27 = int_to_ptr.vmem [resolvable:$true] %s28_s27 }
  0x15   :  { %p327_p9 = scmp.lt.u32.totalorder %s323_s30, %s460_s1 }
  0x17   :  { %p329_p10 = pnand %p327_p9, %p324_p8 }
  0x19   :  { %332 = shalt.err (!%p329_p10)
}
  0x1a   :  { %s333_s8 = scalar_lea.vmem %s29_s27, 2048  ;;  %p338_p12 = scmp.lt.s32.totalorder %s29_s27, %s29_s27 }
  0x1b   :  { %p334_p11 = scmp.ne.s32.totalorder %s29_s27, %s333_s8  ;;  %p339_p13 = scmp.lt.s32.totalorder %s333_s8, %s333_s8 }
  0x1d   :  { %p340_p0 = por %p339_p13, %p338_p12 }
  0x1f   :  { %p341_p1 = pnand %p340_p0, %p334_p11 }
  0x21   :  { %344 = shalt.err (!%p341_p1)
}
  0x22   :  { %34 = dma.hbm_to_vmem [thread:$0]  %s460_s1, 2048, %s29_s27, [#allocation6], %s374_s22, %s374_s22, %s375_s23  }
  0x23   :  { %367 = dma.done.wait [#allocation3], 640  }
  0x24   :  { %368 = vsyncadd [#allocation3], 4294966656 }
  0x25   :  { %369 = dma.done.wait [#allocation6], 2048  }
  0x26   :  { %370 = vsyncadd [#allocation6], 4294965248  ;;  %v377_v0 = vmov 0.0|0.0   ;;  %vm378_vm0 = vmmov 0   ;;  %v379_v1 = vmov 0.0   ;;  %v48_v2 = vld [vmem:[#allocation5] sm:$0xff] }
  0x27   :  { %253 = vmatprep.subr.bf16.mxu0 %v377_v0  ;;  %277 = vmatprep.subr.bf16.mxu1 %v377_v0  ;;  %v49_v3 = vld [vmem:[#allocation5 + $0x8] sm:$0xff]  ;;  %v50_v4 = vld [vmem:[#allocation5 + $0x10] sm:$0xff]  ;;  %v51_v6 = vld [vmem:[#allocation5 + $0x18] sm:$0xff]  ;;  %s380_s11 = smov [#allocation7]  }
  0x28   :  { %238 = vmatprep.mubr.msk.f32.mxu0 %vm378_vm0, %v379_v1  ;;  %247 = vmatprep.mubr.msk.f32.mxu1 %vm378_vm0, %v379_v1  ;;  %v254_v5 = vpack.c.bf16 %v49_v3, %v48_v2  ;;  %v257_v7 = vpack.c.bf16 %v51_v6, %v50_v4  ;;  %v52_v8 = vld [vmem:[#allocation5 + $0x20] sm:$0xff]  ;;  %v53_v9 = vld [vmem:[#allocation5 + $0x28] sm:$0xff]  ;;  %v54_v11 = vld [vmem:[#allocation5 + $0x30] sm:$0xff]  ;;  %s171_s12 = sshll.u32 %s380_s11, 4  ;;  %s172_s12 = int_to_ptr.vmem [resolvable:$true] %s171_s12 }
  0x29   :  { %v260_v10 = vpack.c.bf16 %v53_v9, %v52_v8  ;;  %v55_v12 = vld [vmem:[#allocation5 + $0x38] sm:$0xff]  ;;  %v56_v14 = vld [vmem:[#allocation5 + $0x40] sm:$0xff]  ;;  %v57_v15 = vld [vmem:[#allocation5 + $0x48] sm:$0xff]  ;;  %p350_p3 = scmp.lt.s32.totalorder %s172_s12, %s172_s12 }
  0x2a   :  { %255 = vmatpush3.bf16.msra.mxu0 %v254_v5  ;;  %285 = vmatpush3.bf16.msra.mxu1 %v254_v5  ;;  %v263_v13 = vpack.c.bf16 %v55_v12, %v54_v11  ;;  %v266_v16 = vpack.c.bf16 %v57_v15, %v56_v14  ;;  %v58_v17 = vld [vmem:[#allocation5 + $0x50] sm:$0xff]  ;;  %v59_v18 = vld [vmem:[#allocation5 + $0x58] sm:$0xff]  ;;  %v60_v20 = vld [vmem:[#allocation5 + $0x60] sm:$0xff] }
  0x2b   :  { %256 = vmatprep.subr.bf16.mxu0 %v377_v0  ;;  %278 = vmatprep.subr.bf16.mxu1 %v377_v0  ;;  %v269_v19 = vpack.c.bf16 %v59_v18, %v58_v17  ;;  %v61_v21 = vld [vmem:[#allocation5 + $0x68] sm:$0xff]  ;;  %v62_v23 = vld [vmem:[#allocation5 + $0x70] sm:$0xff]  ;;  %v63_v24 = vld [vmem:[#allocation5 + $0x78] sm:$0xff] }
  0x2c   :  { %v272_v22 = vpack.c.bf16 %v61_v21, %v60_v20  ;;  %v275_v25 = vpack.c.bf16 %v63_v24, %v62_v23  ;;  %v43_v26 = vld [vmem:[#allocation2] sm:$0xff]  ;;  %v46_v27 = vld [vmem:[#allocation2 + $0x18] sm:$0xff]  ;;  %v44_v28 = vld [vmem:[#allocation2 + $0x8] sm:$0xff] }
  0x2d   :  { %v47_v29 = vld [vmem:[#allocation2 + $0x20] sm:$0xff]  ;;  %v45_v30 = vld [vmem:[#allocation2 + $0x10] sm:$0xff] }
  0x2e   :  { %258 = vmatpush3.bf16.msra.mxu0 %v257_v7  ;;  %286 = vmatpush3.bf16.msra.mxu1 %v257_v7  ;;  %v184_v31 = vld [vmem:[%s461_s2] ss:$0 sm:$0xff]  ;;  %s345_s2 = scalar_lea.vmem %s172_s12, 640 }
  0x2f   :  { %259 = vmatprep.subr.bf16.mxu0 %v377_v0  ;;  %279 = vmatprep.subr.bf16.mxu1 %v377_v0  ;;  %p346_p2 = scmp.ne.s32.totalorder %s172_s12, %s345_s2  ;;  %p351_p4 = scmp.lt.s32.totalorder %s345_s2, %s345_s2 }
  0x31   :  { %p352_p5 = por %p351_p4, %p350_p3 }
  0x32   :  { %261 = vmatpush3.bf16.msra.mxu0 %v260_v10  ;;  %287 = vmatpush3.bf16.msra.mxu1 %v260_v10 }
  0x33   :  { %262 = vmatprep.subr.bf16.mxu0 %v377_v0  ;;  %280 = vmatprep.subr.bf16.mxu1 %v377_v0  ;;  %p353_p6 = pnand %p352_p5, %p346_p2 }
  0x36   :  { %264 = vmatpush3.bf16.msra.mxu0 %v263_v13  ;;  %288 = vmatpush3.bf16.msra.mxu1 %v263_v13 }
  0x37   :  { %265 = vmatprep.subr.bf16.mxu0 %v377_v0  ;;  %281 = vmatprep.subr.bf16.mxu1 %v377_v0 }
  0x3a   :  { %267 = vmatpush3.bf16.msra.mxu0 %v266_v16  ;;  %289 = vmatpush3.bf16.msra.mxu1 %v266_v16 }
  0x3b   :  { %268 = vmatprep.subr.bf16.mxu0 %v377_v0  ;;  %282 = vmatprep.subr.bf16.mxu1 %v377_v0 }
  0x3e   :  { %270 = vmatpush3.bf16.msra.mxu0 %v269_v19  ;;  %290 = vmatpush3.bf16.msra.mxu1 %v269_v19 }
  0x3f   :  { %271 = vmatprep.subr.bf16.mxu0 %v377_v0  ;;  %283 = vmatprep.subr.bf16.mxu1 %v377_v0 }
  0x42   :  { %273 = vmatpush3.bf16.msra.mxu0 %v272_v22  ;;  %291 = vmatpush3.bf16.msra.mxu1 %v272_v22 }
  0x43   :  { %274 = vmatprep.subr.bf16.mxu0 %v377_v0  ;;  %284 = vmatprep.subr.bf16.mxu1 %v377_v0 }
  0x46   :  { %276 = vmatpush3.bf16.msra.mxu0 %v275_v25  ;;  %292 = vmatpush3.bf16.msra.mxu1 %v275_v25 }
  0x49   :  { %239 = vmatmul.mubr.f32.vlgmr.msra.gmra.mrb[0].mxu0 %v43_v26  ;;  %248 = vmatmul.mubr.f32.vlgmr.msra.gmra.mrb[0].mxu1 %v46_v27 }
  0x4a   :  { %241 = vmatprep.mubr.msk.f32.mxu0 %vm378_vm0, %v379_v1  ;;  %250 = vmatprep.mubr.msk.f32.mxu1 %vm378_vm0, %v379_v1 }
  0x4d   :  { %242 = vmatmul.mubr.f32.gmra.mrb[2].mxu0 %v44_v28  ;;  %251 = vmatmul.mubr.f32.gmra.mrb[2].mxu1 %v47_v29 }
  0x4e   :  { %244 = vmatprep.mubr.msk.f32.mxu0 %vm378_vm0, %v379_v1 }
  0x51   :  { %245 = vmatmul.mubr.f32.gmra.mrb[4].mxu0 %v45_v30 }
 0x11c   :  { %v137_v32 = vpop.f32.mrb[0].mxu0  ;;  %v152_v33 = vpop.f32.mrb[0].mxu1 }
 0x11d   :  { %v138_v34 = vadd.f32 %v184_v31, %v137_v32  ;;  %v240_v35 = vpop.f32.mrb[1].mxu0  ;;  %v153_v36 = vadd.f32 %v184_v31, %v152_v33  ;;  %v249_v37 = vpop.f32.mrb[1].mxu1 }
 0x11f   :  { %161 = vst [vmem:[#allocation7] sm:$0xff] %v138_v34  ;;  %164 = vst [vmem:[#allocation7 + $0x18] sm:$0xff] %v153_v36 }
 0x120   :  { %v142_v38 = vpop.f32.mrb[2].mxu0  ;;  %v157_v39 = vpop.f32.mrb[2].mxu1 }
 0x121   :  { %v143_v40 = vadd.f32 %v184_v31, %v142_v38  ;;  %v243_v41 = vpop.f32.mrb[3].mxu0  ;;  %v158_v42 = vadd.f32 %v184_v31, %v157_v39  ;;  %v252_v43 = vpop.f32.mrb[3].mxu1 }
 0x123   :  { %162 = vst [vmem:[#allocation7 + $0x8] sm:$0xff] %v143_v40  ;;  %165 = vst [vmem:[#allocation7 + $0x20] sm:$0xff] %v158_v42 }
 0x124   :  { %v147_v44 = vpop.f32.mrb[4].mxu0 }
 0x125   :  { %v148_v45 = vadd.f32 %v184_v31, %v147_v44  ;;  %v246_v46 = vpop.f32.mrb[5].mxu0 }
 0x127   :  { %163 = vst [vmem:[#allocation7 + $0x10] sm:$0xff] %v148_v45 }
 0x128   :  { %356 = shalt.err (!%p353_p6)
}
 0x129   :  { %s357_s15 = scalar_lea.hbm %s462_s3, 640 }
 0x12a   :  { %p358_p7 = scmp.ne.s32.totalorder %s462_s3, %s357_s15  ;;  %p361_p8 = scmp.lt.u32.totalorder %s357_s15, %s462_s3 }
 0x12c   :  { %p363_p9 = pnand %p361_p8, %p358_p7 }
 0x12e   :  { %366 = shalt.err (!%p363_p9)
}
 0x12f   :  { %177 = dma.vmem_to_hbm [thread:$0]  %s172_s12, 640, %s462_s3, [#allocation4], %s374_s22, %s374_s22, %s375_s23  }
 0x130   :  { %371 = dma.done.wait [#allocation4], 640  }
 0x131   :  { %372 = vsyncadd [#allocation4], 4294966656 }
 0x132   :  { %181 = vsyncpa [#allocation3], 1 }
 0x133   :  { %182 = vsyncpa [#allocation6], 1 }
 0x134   :  { %183 = vsyncpa [#allocation4], 1 }

</bundles_post_ra>
